<compile_context>
chip_gen: v7x
topology: tpu7x:2x2x1
jax: 0.10.0
libtpu: 0.0.40
codegen_flags: <defaults>
</compile_context>

<pallas_src>
import functools

import jax
import jax.numpy as jnp
from jax.experimental import pallas as pl
from jax.experimental.pallas import tpu as pltpu


def _round_up(n, m):
    return ((n + m - 1) // m) * m


def _classifier_kernel(*refs, apply_dropout, emit_logits, emit_embedding,
                       compute_dtype):
    it = iter(refs)
    x_ref = next(it)
    w1_ref, b1_ref = next(it), next(it)
    w2_ref, b2_ref = next(it), next(it)
    w3_ref, b3_ref = next(it), next(it)
    w4_ref = b4_ref = keep_ref = None
    if emit_logits:
        w4_ref, b4_ref = next(it), next(it)
        if apply_dropout:
            keep_ref = next(it)
    out_refs = list(it)
    oi = 0
    logits_ref = emb_ref = None
    if emit_logits:
        logits_ref = out_refs[oi]
        oi += 1
    if emit_embedding:
        emb_ref = out_refs[oi]
        oi += 1

    x = x_ref[...].astype(compute_dtype)

    # hidden1 -> ReLU
    h = jnp.dot(x, w1_ref[...].astype(compute_dtype),
                preferred_element_type=jnp.float32) + b1_ref[...]
    h = jnp.maximum(h, 0.0)
    # hidden2 -> ReLU
    h = jnp.dot(h.astype(compute_dtype), w2_ref[...].astype(compute_dtype),
                preferred_element_type=jnp.float32) + b2_ref[...]
    h = jnp.maximum(h, 0.0)
    # hidden3 -> ReLU  (this is the "Embedding", before dropout)
    h = jnp.dot(h.astype(compute_dtype), w3_ref[...].astype(compute_dtype),
                preferred_element_type=jnp.float32) + b3_ref[...]
    h = jnp.maximum(h, 0.0)

    if emit_embedding:
        emb_ref[...] = h.astype(emb_ref.dtype)

    if emit_logits:
        if apply_dropout:
            # nn.Dropout1d on a 2-D (N, C) input drops whole rows: keep_ref holds one
            # value per row, already scaled by 1/(1-p) (0.0 for dropped rows).
            h = h * keep_ref[...]
        logits = jnp.dot(h.astype(compute_dtype),
                         w4_ref[...].astype(compute_dtype),
                         preferred_element_type=jnp.float32) + b4_ref[...]
        logits_ref[...] = logits.astype(logits_ref.dtype)


def classifier_forward(x, params, *, mode="Train", dropout_prob=0.1,
                       rng_key=None, compute_dtype=jnp.float32,
                       batch_tile=256):
    """Pallas forward pass of ClassifierModule.

    mode == 'Train'     -> (logits, embedding), dropout applied
    mode == 'Weights'   -> logits, dropout applied
    mode == 'Test'      -> logits, dropout applied (module.training defaults True)
    mode == 'Transform' -> embedding only (no dropout / output layer)

    compute_dtype: set to jnp.bfloat16 on v6e/v7x for faster MXU + half DMA bytes
    (accumulation stays f32); default f32 preserves reference numerics.
    """
    w1, b1, w2, b2, w3, b3, w4, b4 = params
    batch, in_units = x.shape
    h1, h2, h3 = w1.shape[1], w2.shape[1], w3.shape[1]
    out_units = w4.shape[1]

    emit_logits = mode in ("Train", "Weights", "Test")
    emit_embedding = mode in ("Train", "Transform")
    apply_dropout = emit_logits and dropout_prob > 0.0

    LANE = 128
    in_p = _round_up(in_units, LANE)
    h1_p = _round_up(h1, LANE)
    h2_p = _round_up(h2, LANE)
    h3_p = _round_up(h3, LANE)
    out_p = _round_up(out_units, LANE)

    b8 = _round_up(batch, 8)
    tb = min(batch_tile, b8)
    b_p = _round_up(b8, tb)
    grid = (b_p // tb,)

    def pad2(a, rows, cols):
        return jnp.pad(a, ((0, rows - a.shape[0]), (0, cols - a.shape[1])))

    x_p = pad2(x.astype(jnp.float32), b_p, in_p)
    w1_p, b1_p = pad2(w1, in_p, h1_p), pad2(b1, 1, h1_p)
    w2_p, b2_p = pad2(w2, h1_p, h2_p), pad2(b2, 1, h2_p)
    w3_p, b3_p = pad2(w3, h2_p, h3_p), pad2(b3, 1, h3_p)
    w4_p, b4_p = pad2(w4, h3_p, out_p), pad2(b4, 1, out_p)

    def resident(shape):
        # weights / biases stay resident in VMEM across all batch tiles
        return pl.BlockSpec(shape, lambda i: (0, 0))

    inputs = [x_p, w1_p, b1_p, w2_p, b2_p, w3_p, b3_p]
    in_specs = [
        pl.BlockSpec((tb, in_p), lambda i: (i, 0)),
        resident((in_p, h1_p)), resident((1, h1_p)),
        resident((h1_p, h2_p)), resident((1, h2_p)),
        resident((h2_p, h3_p)), resident((1, h3_p)),
    ]
    if emit_logits:
        inputs += [w4_p, b4_p]
        in_specs += [resident((h3_p, out_p)), resident((1, out_p))]
        if apply_dropout:
            if rng_key is None:
                rng_key = jax.random.PRNGKey(0)
            keep = jax.random.bernoulli(
                rng_key, 1.0 - dropout_prob, (batch, 1)).astype(jnp.float32)
            keep = keep * (1.0 / (1.0 - dropout_prob))
            keep = jnp.pad(keep, ((0, b_p - batch), (0, 0)), constant_values=1.0)
            inputs.append(keep)
            in_specs.append(pl.BlockSpec((tb, 1), lambda i: (i, 0)))

    out_shapes = []
    out_specs = []
    if emit_logits:
        out_shapes.append(jax.ShapeDtypeStruct((b_p, out_p), jnp.float32))
        out_specs.append(pl.BlockSpec((tb, out_p), lambda i: (i, 0)))
    if emit_embedding:
        out_shapes.append(jax.ShapeDtypeStruct((b_p, h3_p), jnp.float32))
        out_specs.append(pl.BlockSpec((tb, h3_p), lambda i: (i, 0)))

    kernel = functools.partial(
        _classifier_kernel,
        apply_dropout=apply_dropout,
        emit_logits=emit_logits,
        emit_embedding=emit_embedding,
        compute_dtype=compute_dtype,
    )

    results = pl.pallas_call(
        kernel,
        grid=grid,
        in_specs=in_specs,
        out_specs=tuple(out_specs),
        out_shape=tuple(out_shapes),
        compiler_params=pltpu.CompilerParams(
            dimension_semantics=("parallel",)),
    )(*inputs)

    ri = 0
    logits = embedding = None
    if emit_logits:
        logits = results[ri][:batch, :out_units]
        ri += 1
    if emit_embedding:
        embedding = results[ri][:batch, :h3]
        ri += 1

    if mode == "Train":
        return logits, embedding
    elif mode == "Transform":
        return embedding
    else:  # 'Weights' or 'Test'
        return logits


def init_params(key, input_units, hidden1, hidden2, hidden3, output_units):
    """Deterministic nn.Linear-style init: U(-1/sqrt(fan_in), 1/sqrt(fan_in))."""
    dims = [(input_units, hidden1), (hidden1, hidden2),
            (hidden2, hidden3), (hidden3, output_units)]
    params = []
    for (fan_in, fan_out) in dims:
        key, kw, kb = jax.random.split(key, 3)
        bound = 1.0 / jnp.sqrt(jnp.float32(fan_in))
        w = jax.random.uniform(kw, (fan_in, fan_out), jnp.float32, -bound, bound)
        b = jax.random.uniform(kb, (1, fan_out), jnp.float32, -bound, bound)
        params += [w, b]
    return tuple(params)


def _reference_forward(x, params):
    """Pure-JAX reference (no dropout) for correctness checking."""
    w1, b1, w2, b2, w3, b3, w4, b4 = params
    h = jnp.maximum(x @ w1 + b1, 0.0)
    h = jnp.maximum(h @ w2 + b2, 0.0)
    h = jnp.maximum(h @ w3 + b3, 0.0)
    return h @ w4 + b4, h


if __name__ == "__main__":
    # Small shapes consistent with the module's forward: X is (batch, input_units).
    batch = 8
    input_units, h1, h2, h3, output_units = 32, 64, 64, 32, 8

    key = jax.random.PRNGKey(0)
    key, kx, kdrop = jax.random.split(key, 3)
    x = jax.random.normal(kx, (batch, input_units), jnp.float32)
    params = init_params(key, input_units, h1, h2, h3, output_units)

    # --- correctness check (dropout disabled so the result is deterministic) ---
    logits0, emb0 = classifier_forward(x, params, mode="Train", dropout_prob=0.0)
    jax.block_until_ready(logits0)
    ref_logits, ref_emb = _reference_forward(x, params)
    assert logits0.shape == (batch, output_units)
    assert emb0.shape == (batch, h3)
    assert jnp.allclose(logits0, ref_logits, atol=1e-4, rtol=1e-4)
    assert jnp.allclose(emb0, ref_emb, atol=1e-4, rtol=1e-4)

    # --- Train mode with dropout active: (logits, embedding) ---
    logits, embedding = classifier_forward(x, params, mode="Train",
                                           dropout_prob=0.1, rng_key=kdrop)
    jax.block_until_ready(logits)
    jax.block_until_ready(embedding)
    assert logits.shape == (batch, output_units)
    assert embedding.shape == (batch, h3)
    # Embedding is pre-dropout, so it must match the reference exactly.
    assert jnp.allclose(embedding, ref_emb, atol=1e-4, rtol=1e-4)

    # --- Transform mode: embedding only (no dropout, no output layer) ---
    emb_only = classifier_forward(x, params, mode="Transform")
    jax.block_until_ready(emb_only)
    assert emb_only.shape == (batch, h3)
    assert jnp.allclose(emb_only, ref_emb, atol=1e-4, rtol=1e-4)

    # --- Weights mode: logits only ---
    w_logits = classifier_forward(x, params, mode="Weights",
                                  dropout_prob=0.1, rng_key=kdrop)
    jax.block_until_ready(w_logits)
    assert w_logits.shape == (batch, output_units)

    print("KERNEL_OK")
</pallas_src>

<mosaic_0001>
module attributes {stable_mosaic.version = 11 : i64} {
  func.func @_classifier_kernel(%arg0: i32, %arg1: memref<8x128xf32, #tpu.memory_space<vmem>>, %arg2: memref<128x128xf32, #tpu.memory_space<vmem>>, %arg3: memref<1x128xf32, #tpu.memory_space<vmem>>, %arg4: memref<128x128xf32, #tpu.memory_space<vmem>>, %arg5: memref<1x128xf32, #tpu.memory_space<vmem>>, %arg6: memref<128x128xf32, #tpu.memory_space<vmem>>, %arg7: memref<1x128xf32, #tpu.memory_space<vmem>>, %arg8: memref<128x128xf32, #tpu.memory_space<vmem>>, %arg9: memref<1x128xf32, #tpu.memory_space<vmem>>, %arg10: memref<8x128xf32, #tpu.memory_space<vmem>>, %arg11: memref<8x128xf32, #tpu.memory_space<vmem>>) attributes {dimension_semantics = [#tpu.dimension_semantics<parallel>], iteration_bounds = array<i64: 1>, scalar_prefetch = 0 : i64, scratch_operands = 0 : i64, tpu.core_type = #tpu.core_type<tc>, window_params = [{transform_indices = @transform_0, window_bounds = array<i64: 8, 128>}, {pipeline_mode = #tpu.pipeline_mode<synchronous>, transform_indices = @transform_1, window_bounds = array<i64: 128, 128>}, {pipeline_mode = #tpu.pipeline_mode<synchronous>, transform_indices = @transform_2, window_bounds = array<i64: 1, 128>}, {pipeline_mode = #tpu.pipeline_mode<synchronous>, transform_indices = @transform_3, window_bounds = array<i64: 128, 128>}, {pipeline_mode = #tpu.pipeline_mode<synchronous>, transform_indices = @transform_4, window_bounds = array<i64: 1, 128>}, {pipeline_mode = #tpu.pipeline_mode<synchronous>, transform_indices = @transform_5, window_bounds = array<i64: 128, 128>}, {pipeline_mode = #tpu.pipeline_mode<synchronous>, transform_indices = @transform_6, window_bounds = array<i64: 1, 128>}, {pipeline_mode = #tpu.pipeline_mode<synchronous>, transform_indices = @transform_7, window_bounds = array<i64: 128, 128>}, {pipeline_mode = #tpu.pipeline_mode<synchronous>, transform_indices = @transform_8, window_bounds = array<i64: 1, 128>}, {transform_indices = @transform_9, window_bounds = array<i64: 8, 128>}, {transform_indices = @transform_10, window_bounds = array<i64: 8, 128>}]} {
    %c0 = arith.constant 0 : index
    %c0_0 = arith.constant 0 : index
    %0 = vector.load %arg1[%c0, %c0_0] : memref<8x128xf32, #tpu.memory_space<vmem>>, vector<8x128xf32>
    %c0_1 = arith.constant 0 : index
    %c0_2 = arith.constant 0 : index
    %1 = vector.load %arg2[%c0_1, %c0_2] : memref<128x128xf32, #tpu.memory_space<vmem>>, vector<128x128xf32>
    %cst = arith.constant dense<0.000000e+00> : vector<8x128xf32>
    %2 = tpu.matmul %0, %1, %cst {dimension_numbers = #tpu.dot_dimension_numbers<[1], [0], [0], [1], [0, 0, 1, 1], [], []>} : vector<8x128xf32>, vector<128x128xf32>, vector<8x128xf32> -> vector<8x128xf32>
    %c0_3 = arith.constant 0 : index
    %c0_4 = arith.constant 0 : index
    %3 = vector.load %arg3[%c0_3, %c0_4] : memref<1x128xf32, #tpu.memory_space<vmem>>, vector<1x128xf32>
    %4 = vector.broadcast %3 : vector<1x128xf32> to vector<8x128xf32>
    %5 = arith.addf %2, %4 : vector<8x128xf32>
    %cst_5 = arith.constant 0.000000e+00 : f32
    %6 = vector.broadcast %cst_5 : f32 to vector<8x128xf32>
    %7 = arith.maximumf %5, %6 : vector<8x128xf32>
    %c0_6 = arith.constant 0 : index
    %c0_7 = arith.constant 0 : index
    %8 = vector.load %arg4[%c0_6, %c0_7] : memref<128x128xf32, #tpu.memory_space<vmem>>, vector<128x128xf32>
    %cst_8 = arith.constant dense<0.000000e+00> : vector<8x128xf32>
    %9 = tpu.matmul %7, %8, %cst_8 {dimension_numbers = #tpu.dot_dimension_numbers<[1], [0], [0], [1], [0, 0, 1, 1], [], []>} : vector<8x128xf32>, vector<128x128xf32>, vector<8x128xf32> -> vector<8x128xf32>
    %c0_9 = arith.constant 0 : index
    %c0_10 = arith.constant 0 : index
    %10 = vector.load %arg5[%c0_9, %c0_10] : memref<1x128xf32, #tpu.memory_space<vmem>>, vector<1x128xf32>
    %11 = vector.broadcast %10 : vector<1x128xf32> to vector<8x128xf32>
    %12 = arith.addf %9, %11 : vector<8x128xf32>
    %cst_11 = arith.constant 0.000000e+00 : f32
    %13 = vector.broadcast %cst_11 : f32 to vector<8x128xf32>
    %14 = arith.maximumf %12, %13 : vector<8x128xf32>
    %c0_12 = arith.constant 0 : index
    %c0_13 = arith.constant 0 : index
    %15 = vector.load %arg6[%c0_12, %c0_13] : memref<128x128xf32, #tpu.memory_space<vmem>>, vector<128x128xf32>
    %cst_14 = arith.constant dense<0.000000e+00> : vector<8x128xf32>
    %16 = tpu.matmul %14, %15, %cst_14 {dimension_numbers = #tpu.dot_dimension_numbers<[1], [0], [0], [1], [0, 0, 1, 1], [], []>} : vector<8x128xf32>, vector<128x128xf32>, vector<8x128xf32> -> vector<8x128xf32>
    %c0_15 = arith.constant 0 : index
    %c0_16 = arith.constant 0 : index
    %17 = vector.load %arg7[%c0_15, %c0_16] : memref<1x128xf32, #tpu.memory_space<vmem>>, vector<1x128xf32>
    %18 = vector.broadcast %17 : vector<1x128xf32> to vector<8x128xf32>
    %19 = arith.addf %16, %18 : vector<8x128xf32>
    %cst_17 = arith.constant 0.000000e+00 : f32
    %20 = vector.broadcast %cst_17 : f32 to vector<8x128xf32>
    %21 = arith.maximumf %19, %20 : vector<8x128xf32>
    %c0_18 = arith.constant 0 : index
    %c0_19 = arith.constant 0 : index
    %22 = vector.load %arg11[%c0_18, %c0_19] : memref<8x128xf32, #tpu.memory_space<vmem>>, vector<8x128xf32>
    tpu.vector_store %arg11[%c0_18, %c0_19], %21 {strides = array<i32>} : memref<8x128xf32, #tpu.memory_space<vmem>>, vector<8x128xf32>,
    %c0_20 = arith.constant 0 : index
    %c0_21 = arith.constant 0 : index
    %23 = vector.load %arg8[%c0_20, %c0_21] : memref<128x128xf32, #tpu.memory_space<vmem>>, vector<128x128xf32>
    %cst_22 = arith.constant dense<0.000000e+00> : vector<8x128xf32>
    %24 = tpu.matmul %21, %23, %cst_22 {dimension_numbers = #tpu.dot_dimension_numbers<[1], [0], [0], [1], [0, 0, 1, 1], [], []>} : vector<8x128xf32>, vector<128x128xf32>, vector<8x128xf32> -> vector<8x128xf32>
    %c0_23 = arith.constant 0 : index
    %c0_24 = arith.constant 0 : index
    %25 = vector.load %arg9[%c0_23, %c0_24] : memref<1x128xf32, #tpu.memory_space<vmem>>, vector<1x128xf32>
    %26 = vector.broadcast %25 : vector<1x128xf32> to vector<8x128xf32>
    %27 = arith.addf %24, %26 : vector<8x128xf32>
    %c0_25 = arith.constant 0 : index
    %c0_26 = arith.constant 0 : index
    %28 = vector.load %arg10[%c0_25, %c0_26] : memref<8x128xf32, #tpu.memory_space<vmem>>, vector<8x128xf32>
    tpu.vector_store %arg10[%c0_25, %c0_26], %27 {strides = array<i32>} : memref<8x128xf32, #tpu.memory_space<vmem>>, vector<8x128xf32>,
    return
  }
  func.func @transform_0(%arg0: i32) -> (i32, i32) {
    %c0_i32 = arith.constant 0 : i32
    %c0_i32_0 = arith.constant 0 : i32
    return %arg0, %c0_i32 : i32, i32
  }
  func.func @transform_1(%arg0: i32) -> (i32, i32) {
    %c0_i32 = arith.constant 0 : i32
    %c0_i32_0 = arith.constant 0 : i32
    %c0_i32_1 = arith.constant 0 : i32
    return %c0_i32, %c0_i32_0 : i32, i32
  }
  func.func @transform_2(%arg0: i32) -> (i32, i32) {
    %c0_i32 = arith.constant 0 : i32
    %c0_i32_0 = arith.constant 0 : i32
    %c0_i32_1 = arith.constant 0 : i32
    return %c0_i32, %c0_i32_0 : i32, i32
  }
  func.func @transform_3(%arg0: i32) -> (i32, i32) {
    %c0_i32 = arith.constant 0 : i32
    %c0_i32_0 = arith.constant 0 : i32
    %c0_i32_1 = arith.constant 0 : i32
    return %c0_i32, %c0_i32_0 : i32, i32
  }
  func.func @transform_4(%arg0: i32) -> (i32, i32) {
    %c0_i32 = arith.constant 0 : i32
    %c0_i32_0 = arith.constant 0 : i32
    %c0_i32_1 = arith.constant 0 : i32
    return %c0_i32, %c0_i32_0 : i32, i32
  }
  func.func @transform_5(%arg0: i32) -> (i32, i32) {
    %c0_i32 = arith.constant 0 : i32
    %c0_i32_0 = arith.constant 0 : i32
    %c0_i32_1 = arith.constant 0 : i32
    return %c0_i32, %c0_i32_0 : i32, i32
  }
  func.func @transform_6(%arg0: i32) -> (i32, i32) {
    %c0_i32 = arith.constant 0 : i32
    %c0_i32_0 = arith.constant 0 : i32
    %c0_i32_1 = arith.constant 0 : i32
    return %c0_i32, %c0_i32_0 : i32, i32
  }
  func.func @transform_7(%arg0: i32) -> (i32, i32) {
    %c0_i32 = arith.constant 0 : i32
    %c0_i32_0 = arith.constant 0 : i32
    %c0_i32_1 = arith.constant 0 : i32
    return %c0_i32, %c0_i32_0 : i32, i32
  }
  func.func @transform_8(%arg0: i32) -> (i32, i32) {
    %c0_i32 = arith.constant 0 : i32
    %c0_i32_0 = arith.constant 0 : i32
    %c0_i32_1 = arith.constant 0 : i32
    return %c0_i32, %c0_i32_0 : i32, i32
  }
  func.func @transform_9(%arg0: i32) -> (i32, i32) {
    %c0_i32 = arith.constant 0 : i32
    %c0_i32_0 = arith.constant 0 : i32
    return %arg0, %c0_i32 : i32, i32
  }
  func.func @transform_10(%arg0: i32) -> (i32, i32) {
    %c0_i32 = arith.constant 0 : i32
    %c0_i32_0 = arith.constant 0 : i32
    return %arg0, %c0_i32 : i32, i32
  }
}

</mosaic_0001>

<bundles_post_ra>
// kernel: tpu_custom_call.1
= control target key start
LH: loop header
LB: loop body
LE: loop exit
PB: predicated region body
PF: predicated region fallthrough
CT: control target
= control target key end

     0   :  { %16 = vsyncpa [#allocation3], 0  ;;  %s1210_s0 = inlined_call_operand.hbm [shape: f32[8,128], index: 0, kind: input, shape index: {}]   ;;  %s1211_s1 = inlined_call_operand.hbm [shape: f32[128,128], index: 1, kind: input, shape index: {}]   ;;  %s1212_s2 = inlined_call_operand.vmem [shape: f32[1,128], index: 2, kind: input, shape index: {}]   ;;  %s1213_s3 = inlined_call_operand.hbm [shape: f32[128,128], index: 3, kind: input, shape index: {}]   ;;  %s1214_s4 = inlined_call_operand.vmem [shape: f32[1,128], index: 4, kind: input, shape index: {}]   ;;  %s1215_s5 = inlined_call_operand.hbm [shape: f32[128,128], index: 5, kind: input, shape index: {}]   ;;  %s1216_s6 = inlined_call_operand.vmem [shape: f32[1,128], index: 6, kind: input, shape index: {}]   ;;  %s1217_s7 = inlined_call_operand.hbm [shape: f32[128,128], index: 7, kind: input, shape index: {}]   ;;  %s1218_s8 = inlined_call_operand.vmem [shape: f32[1,128], index: 8, kind: input, shape index: {}]   ;;  %s1219_s9 = inlined_call_operand.hbm [shape: f32[8,128], index: 9, kind: output, shape index: {0}]   ;;  %s1220_s10 = inlined_call_operand.hbm [shape: f32[8,128], index: 10, kind: output, shape index: {1}]  }
   0x1   :  { %17 = vsyncpa [#allocation6], 0 }
   0x2   :  { %18 = vsyncpa [#allocation9], 0 }
   0x3   :  { %19 = vsyncpa [#allocation4], 0 }
   0x4   :  { %20 = vsyncpa [#allocation13], 0  ;;  %s995_s13 = smov [#allocation5]   ;;  %s831_s17 = scalar_lea.hbm %s1211_s1, 2048 }
   0x5   :  { %s36_s14 = sshll.u32 %s995_s13, 4  ;;  %p832_p0 = scmp.ne.s32.totalorder %s1211_s1, %s831_s17  ;;  %s37_s14 = int_to_ptr.vmem [resolvable:$true] %s36_s14 }
   0x6   :  { %p835_p1 = scmp.lt.u32.totalorder %s831_s17, %s1211_s1 }
   0x8   :  { %p837_p2 = pnand %p835_p1, %p832_p0 }
   0xa   :  { %840 = shalt.err (!%p837_p2)
}
   0xb   :  { %s841_s22 = scalar_lea.vmem %s37_s14, 2048  ;;  %p846_p4 = scmp.lt.s32.totalorder %s37_s14, %s37_s14 }
   0xc   :  { %p842_p3 = scmp.ne.s32.totalorder %s37_s14, %s841_s22  ;;  %p847_p5 = scmp.lt.s32.totalorder %s841_s22, %s841_s22 }
   0xe   :  { %p848_p6 = por %p847_p5, %p846_p4 }
  0x10   :  { %p849_p7 = pnand %p848_p6, %p842_p3 }
  0x12   :  { %852 = shalt.err (!%p849_p7)
}
  0x13   :  { %s996_s23 = smov 128   ;;  %s997_s24 = smov 8  }
  0x14   :  { %42 = dma.hbm_to_vmem [thread:$0]  %s1211_s1, 2048, %s37_s14, [#allocation6], %s996_s23, %s996_s23, %s997_s24  }
  0x15   :  { %s998_s27 = smov [#allocation8]   ;;  %s999_s29 = smov [#allocation2]  }
  0x16   :  { %s64_s28 = sshll.u32 %s998_s27, 4  ;;  %s27_s30 = sshll.u32 %s999_s29, 4  ;;  %s65_s28 = int_to_ptr.vmem [resolvable:$true] %s64_s28  ;;  %s28_s30 = int_to_ptr.vmem [resolvable:$true] %s27_s30 }
  0x17   :  { %s853_s13 = scalar_lea.hbm %s1215_s5, 2048 }
  0x18   :  { %p854_p8 = scmp.ne.s32.totalorder %s1215_s5, %s853_s13  ;;  %p857_p9 = scmp.lt.u32.totalorder %s853_s13, %s1215_s5 }
  0x1a   :  { %p859_p10 = pnand %p857_p9, %p854_p8 }
  0x1c   :  { %862 = shalt.err (!%p859_p10)
}
  0x1d   :  { %s863_s1 = scalar_lea.vmem %s65_s28, 2048  ;;  %p868_p12 = scmp.lt.s32.totalorder %s65_s28, %s65_s28 }
  0x1e   :  { %p864_p11 = scmp.ne.s32.totalorder %s65_s28, %s863_s1  ;;  %p869_p13 = scmp.lt.s32.totalorder %s863_s1, %s863_s1 }
  0x20   :  { %p870_p0 = por %p869_p13, %p868_p12 }
  0x22   :  { %p871_p1 = pnand %p870_p0, %p864_p11 }
  0x24   :  { %874 = shalt.err (!%p871_p1)
}
  0x25   :  { %70 = dma.hbm_to_vmem [thread:$0]  %s1215_s5, 2048, %s65_s28, [#allocation9], %s996_s23, %s996_s23, %s997_s24  }
  0x26   :  { %s875_s22 = scalar_lea.hbm %s1210_s0, 128 }
  0x27   :  { %p876_p2 = scmp.ne.s32.totalorder %s1210_s0, %s875_s22  ;;  %p879_p3 = scmp.lt.u32.totalorder %s875_s22, %s1210_s0 }
  0x29   :  { %p881_p4 = pnand %p879_p3, %p876_p2 }
  0x2b   :  { %884 = shalt.err (!%p881_p4)
}
  0x2c   :  { %s885_s11 = scalar_lea.vmem %s28_s30, 128  ;;  %p890_p6 = scmp.lt.s32.totalorder %s28_s30, %s28_s30 }
  0x2d   :  { %p886_p5 = scmp.ne.s32.totalorder %s28_s30, %s885_s11  ;;  %p891_p7 = scmp.lt.s32.totalorder %s885_s11, %s885_s11 }
  0x2f   :  { %p892_p8 = por %p891_p7, %p890_p6 }
  0x31   :  { %p893_p9 = pnand %p892_p8, %p886_p5 }
  0x33   :  { %896 = shalt.err (!%p893_p9)
}
  0x34   :  { %30 = dma.hbm_to_vmem [thread:$0]  %s1210_s0, 128, %s28_s30, [#allocation3]  }
  0x35   :  { %s1000_s12 = smov [#allocation7]   ;;  %s1001_s15 = smov [#allocation10]  }
  0x36   :  { %s50_s13 = sshll.u32 %s1000_s12, 4  ;;  %s78_s16 = sshll.u32 %s1001_s15, 4  ;;  %s51_s13 = int_to_ptr.vmem [resolvable:$true] %s50_s13  ;;  %s79_s16 = int_to_ptr.vmem [resolvable:$true] %s78_s16 }
  0x37   :  { %s897_s1 = scalar_lea.hbm %s1213_s3, 2048 }
  0x38   :  { %p898_p10 = scmp.ne.s32.totalorder %s1213_s3, %s897_s1  ;;  %p901_p11 = scmp.lt.u32.totalorder %s897_s1, %s1213_s3 }
  0x3a   :  { %p903_p12 = pnand %p901_p11, %p898_p10 }
  0x3c   :  { %906 = shalt.err (!%p903_p12)
}
  0x3d   :  { %s907_s0 = scalar_lea.vmem %s51_s13, 2048  ;;  %p912_p0 = scmp.lt.s32.totalorder %s51_s13, %s51_s13 }
  0x3e   :  { %p908_p13 = scmp.ne.s32.totalorder %s51_s13, %s907_s0  ;;  %p913_p1 = scmp.lt.s32.totalorder %s907_s0, %s907_s0 }
  0x40   :  { %p914_p2 = por %p913_p1, %p912_p0 }
  0x42   :  { %p915_p3 = pnand %p914_p2, %p908_p13 }
  0x44   :  { %918 = shalt.err (!%p915_p3)
}
  0x45   :  { %56 = dma.hbm_to_vmem [thread:$0]  %s1213_s3, 2048, %s51_s13, [#allocation6], %s996_s23, %s996_s23, %s997_s24  }
  0x46   :  { %s919_s27 = scalar_lea.hbm %s1217_s7, 2048 }
  0x47   :  { %p920_p4 = scmp.ne.s32.totalorder %s1217_s7, %s919_s27  ;;  %p923_p5 = scmp.lt.u32.totalorder %s919_s27, %s1217_s7 }
  0x49   :  { %p925_p6 = pnand %p923_p5, %p920_p4 }
  0x4b   :  { %928 = shalt.err (!%p925_p6)
}
  0x4c   :  { %s929_s12 = scalar_lea.vmem %s79_s16, 2048  ;;  %p934_p8 = scmp.lt.s32.totalorder %s79_s16, %s79_s16 }
  0x4d   :  { %p930_p7 = scmp.ne.s32.totalorder %s79_s16, %s929_s12  ;;  %p935_p9 = scmp.lt.s32.totalorder %s929_s12, %s929_s12 }
  0x4f   :  { %p936_p10 = por %p935_p9, %p934_p8 }
  0x51   :  { %p937_p11 = pnand %p936_p10, %p930_p7 }
  0x53   :  { %940 = shalt.err (!%p937_p11)
}
  0x54   :  { %84 = dma.hbm_to_vmem [thread:$0]  %s1217_s7, 2048, %s79_s16, [#allocation9], %s996_s23, %s996_s23, %s997_s24  }
  0x55   :  { %985 = dma.done.wait [#allocation3], 128  }
  0x56   :  { %986 = vsyncadd [#allocation3], 4294967168 }
  0x57   :  { %987 = dma.done.wait [#allocation6], 4096  }
  0x58   :  { %988 = vsyncadd [#allocation6], 4294963200 }
  0x59   :  { %989 = dma.done.wait [#allocation9], 4096  }
  0x5a   :  { %990 = vsyncadd [#allocation9], 4294963200  ;;  %v1002_v0 = vmov 0.0|0.0   ;;  %vm1003_vm0 = vmmov 0   ;;  %v1004_v1 = vmov 0.0   ;;  %v103_v2 = vld [vmem:[#allocation5] sm:$0xff] }
  0x5b   :  { %723 = vmatprep.subr.bf16.mxu0 %v1002_v0  ;;  %615 = vmatprep.mubr.msk.f32.mxu0 %vm1003_vm0, %v1004_v1  ;;  %v104_v3 = vld [vmem:[#allocation5 + $0x8] sm:$0xff]  ;;  %v105_v4 = vld [vmem:[#allocation5 + $0x10] sm:$0xff]  ;;  %v106_v6 = vld [vmem:[#allocation5 + $0x18] sm:$0xff] }
  0x5c   :  { %747 = vmatprep.subr.bf16.mxu1 %v1002_v0  ;;  %650 = vmatprep.mubr.msk.f32.mxu1 %vm1003_vm0, %v1004_v1  ;;  %v724_v5 = vpack.c.bf16 %v104_v3, %v103_v2  ;;  %v727_v7 = vpack.c.bf16 %v106_v6, %v105_v4  ;;  %v107_v8 = vld [vmem:[#allocation5 + $0x20] sm:$0xff]  ;;  %v108_v9 = vld [vmem:[#allocation5 + $0x28] sm:$0xff]  ;;  %v199_v12 = vld [vmem:[#allocation7 + $0x10] sm:$0xff] }
  0x5d   :  { %v197_v10 = vld [vmem:[#allocation7] sm:$0xff]  ;;  %v198_v11 = vld [vmem:[#allocation7 + $0x8] sm:$0xff]  ;;  %v200_v13 = vld [vmem:[#allocation7 + $0x18] sm:$0xff]  ;;  %v730_v14 = vpack.c.bf16 %v108_v9, %v107_v8 }
  0x5e   :  { %725 = vmatpush3.bf16.msra.mxu0 %v724_v5  ;;  %v748_v15 = vpack.c.bf16 %v198_v11, %v197_v10  ;;  %v109_v16 = vld [vmem:[#allocation5 + $0x30] sm:$0xff]  ;;  %v110_v17 = vld [vmem:[#allocation5 + $0x38] sm:$0xff]  ;;  %v751_v18 = vpack.c.bf16 %v200_v13, %v199_v12  ;;  %v201_v19 = vld [vmem:[#allocation7 + $0x20] sm:$0xff] }
  0x5f   :  { %726 = vmatprep.subr.bf16.mxu0 %v1002_v0  ;;  %v202_v20 = vld [vmem:[#allocation7 + $0x28] sm:$0xff]  ;;  %v733_v21 = vpack.c.bf16 %v110_v17, %v109_v16  ;;  %v111_v22 = vld [vmem:[#allocation5 + $0x40] sm:$0xff]  ;;  %v203_v25 = vld [vmem:[#allocation7 + $0x30] sm:$0xff] }
  0x60   :  { %749 = vmatpush3.bf16.msra.mxu1 %v748_v15  ;;  %v112_v23 = vld [vmem:[#allocation5 + $0x48] sm:$0xff]  ;;  %v754_v24 = vpack.c.bf16 %v202_v20, %v201_v19  ;;  %v204_v26 = vld [vmem:[#allocation7 + $0x38] sm:$0xff]  ;;  %v113_v28 = vld [vmem:[#allocation5 + $0x50] sm:$0xff] }
  0x61   :  { %750 = vmatprep.subr.bf16.mxu1 %v1002_v0  ;;  %v736_v27 = vpack.c.bf16 %v112_v23, %v111_v22  ;;  %v114_v29 = vld [vmem:[#allocation5 + $0x58] sm:$0xff]  ;;  %v757_v30 = vpack.c.bf16 %v204_v26, %v203_v25  ;;  %v205_v31 = vld [vmem:[#allocation7 + $0x40] sm:$0xff]  ;;  %v206_v32 = vld [vmem:[#allocation7 + $0x48] sm:$0xff] }
  0x62   :  { %728 = vmatpush3.bf16.msra.mxu0 %v727_v7  ;;  %v739_v33 = vpack.c.bf16 %v114_v29, %v113_v28  ;;  %v115_v34 = vld [vmem:[#allocation5 + $0x60] sm:$0xff]  ;;  %v116_v35 = vld [vmem:[#allocation5 + $0x68] sm:$0xff]  ;;  %v760_v36 = vpack.c.bf16 %v206_v32, %v205_v31  ;;  %v207_v37 = vld [vmem:[#allocation7 + $0x50] sm:$0xff] }
  0x63   :  { %729 = vmatprep.subr.bf16.mxu0 %v1002_v0  ;;  %v208_v38 = vld [vmem:[#allocation7 + $0x58] sm:$0xff]  ;;  %v742_v39 = vpack.c.bf16 %v116_v35, %v115_v34  ;;  %v117_v40 = vld [vmem:[#allocation5 + $0x70] sm:$0xff]  ;;  %v209_v43 = vld [vmem:[#allocation7 + $0x60] sm:$0xff] }
  0x64   :  { %752 = vmatpush3.bf16.msra.mxu1 %v751_v18  ;;  %v118_v41 = vld [vmem:[#allocation5 + $0x78] sm:$0xff]  ;;  %v763_v42 = vpack.c.bf16 %v208_v38, %v207_v37  ;;  %v210_v44 = vld [vmem:[#allocation7 + $0x68] sm:$0xff]  ;;  %v211_v48 = vld [vmem:[#allocation7 + $0x70] sm:$0xff] }
  0x65   :  { %753 = vmatprep.subr.bf16.mxu1 %v1002_v0  ;;  %v745_v45 = vpack.c.bf16 %v118_v41, %v117_v40  ;;  %v766_v46 = vpack.c.bf16 %v210_v44, %v209_v43  ;;  %v102_v47 = vld [vmem:[#allocation2] sm:$0xff]  ;;  %v291_v51 = vld [vmem:[#allocation8] sm:$0xff]  ;;  %v292_v52 = vld [vmem:[#allocation8 + $0x8] sm:$0xff] }
  0x66   :  { %731 = vmatpush3.bf16.msra.mxu0 %v730_v14  ;;  %v212_v49 = vld [vmem:[#allocation7 + $0x78] sm:$0xff]  ;;  %v293_v53 = vld [vmem:[#allocation8 + $0x10] sm:$0xff]  ;;  %v772_v54 = vpack.c.bf16 %v292_v52, %v291_v51  ;;  %v295_v57 = vld [vmem:[#allocation8 + $0x20] sm:$0xff] }
  0x67   :  { %732 = vmatprep.subr.bf16.mxu0 %v1002_v0  ;;  %v769_v50 = vpack.c.bf16 %v212_v49, %v211_v48  ;;  %v294_v55 = vld [vmem:[#allocation8 + $0x18] sm:$0xff]  ;;  %v296_v58 = vld [vmem:[#allocation8 + $0x28] sm:$0xff]  ;;  %v297_v60 = vld [vmem:[#allocation8 + $0x30] sm:$0xff] }
  0x68   :  { %755 = vmatpush3.bf16.msra.mxu1 %v754_v24  ;;  %v775_v56 = vpack.c.bf16 %v294_v55, %v293_v53  ;;  %v778_v59 = vpack.c.bf16 %v296_v58, %v295_v57  ;;  %v298_v61 = vld [vmem:[#allocation8 + $0x38] sm:$0xff]  ;;  %v299_v63 = vld [vmem:[#allocation8 + $0x40] sm:$0xff]  ;;  %v300_v2 = vld [vmem:[#allocation8 + $0x48] sm:$0xff] }
  0x69   :  { %756 = vmatprep.subr.bf16.mxu1 %v1002_v0  ;;  %v781_v62 = vpack.c.bf16 %v298_v61, %v297_v60  ;;  %v784_v3 = vpack.c.bf16 %v300_v2, %v299_v63  ;;  %v301_v4 = vld [vmem:[#allocation8 + $0x50] sm:$0xff]  ;;  %v302_v5 = vld [vmem:[#allocation8 + $0x58] sm:$0xff]  ;;  %v303_v7 = vld [vmem:[#allocation8 + $0x60] sm:$0xff] }
  0x6a   :  { %734 = vmatpush3.bf16.msra.mxu0 %v733_v21  ;;  %v787_v6 = vpack.c.bf16 %v302_v5, %v301_v4  ;;  %v304_v8 = vld [vmem:[#allocation8 + $0x68] sm:$0xff]  ;;  %v511_v10 = vld [vmem:[%s1212_s2] ss:$0 sm:$0xff]  ;;  %v305_v15 = vld [vmem:[#allocation8 + $0x70] sm:$0xff] }
  0x6b   :  { %735 = vmatprep.subr.bf16.mxu0 %v1002_v0  ;;  %v790_v9 = vpack.c.bf16 %v304_v8, %v303_v7  ;;  %v306_v16 = vld [vmem:[#allocation8 + $0x78] sm:$0xff]  ;;  %v386_v18 = vld [vmem:[#allocation10] sm:$0xff]  ;;  %v387_v19 = vld [vmem:[#allocation10 + $0x8] sm:$0xff] }
  0x6c   :  { %758 = vmatpush3.bf16.msra.mxu1 %v757_v30  ;;  %v793_v17 = vpack.c.bf16 %v306_v16, %v305_v15  ;;  %v388_v20 = vld [vmem:[#allocation10 + $0x10] sm:$0xff]  ;;  %v796_v21 = vpack.c.bf16 %v387_v19, %v386_v18  ;;  %v389_v22 = vld [vmem:[#allocation10 + $0x18] sm:$0xff]  ;;  %v390_v24 = vld [vmem:[#allocation10 + $0x20] sm:$0xff] }
  0x6d   :  { %759 = vmatprep.subr.bf16.mxu1 %v1002_v0  ;;  %v799_v23 = vpack.c.bf16 %v389_v22, %v388_v20  ;;  %v391_v25 = vld [vmem:[#allocation10 + $0x28] sm:$0xff]  ;;  %v394_v29 = vld [vmem:[#allocation10 + $0x40] sm:$0xff]  ;;  %v396_v32 = vld [vmem:[#allocation10 + $0x50] sm:$0xff] }
  0x6e   :  { %737 = vmatpush3.bf16.msra.mxu0 %v736_v27  ;;  %v802_v26 = vpack.c.bf16 %v391_v25, %v390_v24  ;;  %v393_v27 = vld [vmem:[#allocation10 + $0x38] sm:$0xff]  ;;  %v395_v30 = vld [vmem:[#allocation10 + $0x48] sm:$0xff]  ;;  %v398_v35 = vld [vmem:[#allocation10 + $0x60] sm:$0xff] }
  0x6f   :  { %738 = vmatprep.subr.bf16.mxu0 %v1002_v0  ;;  %v808_v31 = vpack.c.bf16 %v395_v30, %v394_v29  ;;  %v512_v38 = vld [vmem:[%s1214_s4] ss:$0 sm:$0xff]  ;;  %v400_v43 = vld [vmem:[#allocation10 + $0x70] sm:$0xff]  ;;  %s1005_s4 = smov [#allocation12]  }
  0x70   :  { %761 = vmatpush3.bf16.msra.mxu1 %v760_v36  ;;  %v399_v36 = vld [vmem:[#allocation10 + $0x68] sm:$0xff]  ;;  %v401_v44 = vld [vmem:[#allocation10 + $0x78] sm:$0xff]  ;;  %s496_s17 = sshll.u32 %s1005_s4, 4  ;;  %s497_s17 = int_to_ptr.vmem [resolvable:$true] %s496_s17 }
  0x71   :  { %762 = vmatprep.subr.bf16.mxu1 %v1002_v0  ;;  %v814_v37 = vpack.c.bf16 %v399_v36, %v398_v35  ;;  %s941_s18 = scalar_lea.vmem %s497_s17, 128  ;;  %p946_p13 = scmp.lt.s32.totalorder %s497_s17, %s497_s17 }
  0x72   :  { %740 = vmatpush3.bf16.msra.mxu0 %v739_v33  ;;  %v397_v33 = vld [vmem:[#allocation10 + $0x58] sm:$0xff]  ;;  %p942_p12 = scmp.ne.s32.totalorder %s497_s17, %s941_s18  ;;  %p947_p0 = scmp.lt.s32.totalorder %s941_s18, %s941_s18 }
  0x73   :  { %741 = vmatprep.subr.bf16.mxu0 %v1002_v0  ;;  %v811_v34 = vpack.c.bf16 %v397_v33, %v396_v32 }
  0x74   :  { %764 = vmatpush3.bf16.msra.mxu1 %v763_v42  ;;  %p948_p1 = por %p947_p0, %p946_p13 }
  0x75   :  { %765 = vmatprep.subr.bf16.mxu1 %v1002_v0 }
  0x76   :  { %743 = vmatpush3.bf16.msra.mxu0 %v742_v39  ;;  %p949_p2 = pnand %p948_p1, %p942_p12 }
  0x77   :  { %744 = vmatprep.subr.bf16.mxu0 %v1002_v0 }
  0x78   :  { %767 = vmatpush3.bf16.msra.mxu1 %v766_v46  ;;  %v513_v46 = vld [vmem:[%s1216_s6] ss:$0 sm:$0xff] }
  0x79   :  { %768 = vmatprep.subr.bf16.mxu1 %v1002_v0 }
  0x7a   :  { %746 = vmatpush3.bf16.msra.mxu0 %v745_v45  ;;  %v817_v45 = vpack.c.bf16 %v401_v44, %v400_v43 }
  0x7b   :  { %771 = vmatprep.subr.bf16.mxu0 %v1002_v0 }
  0x7c   :  { %770 = vmatpush3.bf16.msra.mxu1 %v769_v50 }
  0x7d   :  { %616 = vmatmul.mubr.f32.vlgmr.msra.gmra.mrb[0].mxu0 %v102_v47  ;;  %795 = vmatprep.subr.bf16.mxu1 %v1002_v0 }
  0x7e   :  { %685 = vmatprep.mubr.msk.f32.mxu0 %vm1003_vm0, %v1004_v1  ;;  %773 = vmatpush3.bf16.msra.mxu0 %v772_v54 }
  0x7f   :  { %774 = vmatprep.subr.bf16.mxu0 %v1002_v0 }
  0x82   :  { %776 = vmatpush3.bf16.msra.mxu0 %v775_v56 }
  0x83   :  { %777 = vmatprep.subr.bf16.mxu0 %v1002_v0 }
  0x86   :  { %779 = vmatpush3.bf16.msra.mxu0 %v778_v59 }
  0x87   :  { %780 = vmatprep.subr.bf16.mxu0 %v1002_v0 }
  0x8a   :  { %782 = vmatpush3.bf16.msra.mxu0 %v781_v62 }
  0x8b   :  { %783 = vmatprep.subr.bf16.mxu0 %v1002_v0 }
  0x8e   :  { %785 = vmatpush3.bf16.msra.mxu0 %v784_v3 }
  0x8f   :  { %786 = vmatprep.subr.bf16.mxu0 %v1002_v0 }
  0x92   :  { %788 = vmatpush3.bf16.msra.mxu0 %v787_v6 }
  0x93   :  { %789 = vmatprep.subr.bf16.mxu0 %v1002_v0 }
  0x96   :  { %791 = vmatpush3.bf16.msra.mxu0 %v790_v9 }
  0x97   :  { %792 = vmatprep.subr.bf16.mxu0 %v1002_v0 }
  0x9a   :  { %794 = vmatpush3.bf16.msra.mxu0 %v793_v17 }
 0x150   :  { %v192_v11 = vpop.f32.mrb[0].mxu0 }
 0x151   :  { %v193_v12 = vadd.f32 %v511_v10, %v192_v11  ;;  %v617_v13 = vpop.f32.mrb[1].mxu0 }
 0x153   :  { %v196_v14 = vmax.f32 %v193_v12, 0.0 }
 0x155   :  { %651 = vmatmul.mubr.f32.vlgmr.msra.gmra.mrb[0].mxu1 %v196_v14 }
 0x156   :  { %720 = vmatprep.mubr.msk.f32.mxu1 %vm1003_vm0, %v1004_v1  ;;  %797 = vmatpush3.bf16.msra.mxu1 %v796_v21  ;;  %v392_v1 = vld [vmem:[#allocation10 + $0x30] sm:$0xff] }
 0x157   :  { %798 = vmatprep.subr.bf16.mxu1 %v1002_v0  ;;  %v805_v28 = vpack.c.bf16 %v393_v27, %v392_v1 }
 0x15a   :  { %800 = vmatpush3.bf16.msra.mxu1 %v799_v23 }
 0x15b   :  { %801 = vmatprep.subr.bf16.mxu1 %v1002_v0 }
 0x15e   :  { %803 = vmatpush3.bf16.msra.mxu1 %v802_v26 }
 0x15f   :  { %804 = vmatprep.subr.bf16.mxu1 %v1002_v0 }
 0x162   :  { %806 = vmatpush3.bf16.msra.mxu1 %v805_v28 }
 0x163   :  { %807 = vmatprep.subr.bf16.mxu1 %v1002_v0 }
 0x166   :  { %809 = vmatpush3.bf16.msra.mxu1 %v808_v31 }
 0x167   :  { %810 = vmatprep.subr.bf16.mxu1 %v1002_v0 }
 0x16a   :  { %812 = vmatpush3.bf16.msra.mxu1 %v811_v34 }
 0x16b   :  { %813 = vmatprep.subr.bf16.mxu1 %v1002_v0 }
 0x16e   :  { %815 = vmatpush3.bf16.msra.mxu1 %v814_v37 }
 0x16f   :  { %816 = vmatprep.subr.bf16.mxu1 %v1002_v0 }
 0x172   :  { %818 = vmatpush3.bf16.msra.mxu1 %v817_v45 }
 0x228   :  { %v286_v39 = vpop.f32.mrb[0].mxu1 }
 0x229   :  { %v287_v40 = vadd.f32 %v512_v38, %v286_v39  ;;  %v652_v41 = vpop.f32.mrb[1].mxu1 }
 0x22b   :  { %v290_v42 = vmax.f32 %v287_v40, 0.0 }
 0x22d   :  { %686 = vmatmul.mubr.f32.vlgmr.msra.gmra.mrb[2].mxu0 %v290_v42 }
 0x300   :  { %v380_v47 = vpop.f32.mrb[2].mxu0 }
 0x301   :  { %v381_v48 = vadd.f32 %v513_v46, %v380_v47  ;;  %v687_v0 = vpop.f32.mrb[3].mxu0 }
 0x303   :  { %v384_v49 = vmax.f32 %v381_v48, 0.0 }
 0x305   :  { %385 = vst [vmem:[#allocation12] sm:$0xff] %v384_v49  ;;  %721 = vmatmul.mubr.f32.vlgmr.msra.gmra.mrb[2].mxu1 %v384_v49 }
 0x306   :  { %952 = shalt.err (!%p949_p2)
}
 0x307   :  { %s953_s6 = scalar_lea.hbm %s1220_s10, 128 }
 0x308   :  { %p954_p3 = scmp.ne.s32.totalorder %s1220_s10, %s953_s6  ;;  %p957_p4 = scmp.lt.u32.totalorder %s953_s6, %s1220_s10 }
 0x30a   :  { %p959_p5 = pnand %p957_p4, %p954_p3 }
 0x30c   :  { %962 = shalt.err (!%p959_p5)
}
 0x30d   :  { %499 = dma.vmem_to_hbm [thread:$0]  %s497_s17, 128, %s1220_s10, [#allocation13]   ;;  %v514_v50 = vld [vmem:[%s1218_s8] ss:$0 sm:$0xff] }
 0x30e   :  { %s1006_s27 = smov [#allocation11]  }
 0x30f   :  { %s486_s29 = sshll.u32 %s1006_s27, 4  ;;  %s487_s29 = int_to_ptr.vmem [resolvable:$true] %s486_s29 }
 0x310   :  { %s963_s11 = scalar_lea.vmem %s487_s29, 128  ;;  %p968_p7 = scmp.lt.s32.totalorder %s487_s29, %s487_s29 }
 0x311   :  { %p964_p6 = scmp.ne.s32.totalorder %s487_s29, %s963_s11  ;;  %p969_p8 = scmp.lt.s32.totalorder %s963_s11, %s963_s11 }
 0x313   :  { %p970_p9 = por %p969_p8, %p968_p7 }
 0x315   :  { %p971_p10 = pnand %p970_p9, %p964_p6 }
 0x3d8   :  { %v475_v51 = vpop.f32.mrb[2].mxu1 }
 0x3d9   :  { %v476_v52 = vadd.f32 %v514_v50, %v475_v51  ;;  %v722_v53 = vpop.f32.mrb[3].mxu1 }
 0x3db   :  { %479 = vst [vmem:[#allocation11] sm:$0xff] %v476_v52 }
 0x3dc   :  { %974 = shalt.err (!%p971_p10)
}
 0x3dd   :  { %s975_s28 = scalar_lea.hbm %s1219_s9, 128 }
 0x3de   :  { %p976_p11 = scmp.ne.s32.totalorder %s1219_s9, %s975_s28  ;;  %p979_p12 = scmp.lt.u32.totalorder %s975_s28, %s1219_s9 }
 0x3e0   :  { %p981_p13 = pnand %p979_p12, %p976_p11 }
 0x3e2   :  { %984 = shalt.err (!%p981_p13)
}
 0x3e3   :  { %489 = dma.vmem_to_hbm [thread:$0]  %s487_s29, 128, %s1219_s9, [#allocation4]  }
 0x3e4   :  { %991 = dma.done.wait [#allocation4], 128  }
 0x3e5   :  { %992 = vsyncadd [#allocation4], 4294967168 }
 0x3e6   :  { %993 = dma.done.wait [#allocation13], 128  }
 0x3e7   :  { %994 = vsyncadd [#allocation13], 4294967168 }
 0x3e8   :  { %506 = vsyncpa [#allocation3], 1 }
 0x3e9   :  { %507 = vsyncpa [#allocation6], 1 }
 0x3ea   :  { %508 = vsyncpa [#allocation9], 1 }
 0x3eb   :  { %509 = vsyncpa [#allocation4], 1 }
 0x3ec   :  { %510 = vsyncpa [#allocation13], 1 }

</bundles_post_ra>
